<compile_context>
chip_gen: v7x
topology: tpu7x:2x2x1
jax: 0.10.0
libtpu: 0.0.40
codegen_flags: <defaults>
</compile_context>

<pallas_src>
import jax
import jax.numpy as jnp
from jax.experimental import pallas as pl
from jax.experimental.pallas import tpu as pltpu


def _round_up(v, m):
    return (v + m - 1) // m * m


def _choose_tile_b(B):
    """Batch tile: >=256 rows when the batch allows it, 16-row aligned (bf16)."""
    if B >= 1024:
        return 512
    if B >= 256:
        return 256
    return _round_up(B, 16)


def _vf_kernel(x_ref, w1x_ref, bias1_ref, w2_ref, b2_ref, o_ref):
    """One batch-tile of the CFM vector-field MLP.

    x_ref    : (TB, Dp)  bf16 input tile
    w1x_ref  : (Dp, Hp)  bf16 first-layer weight (x part), resident
    bias1_ref: (1,  Hp)  f32  effective first-layer bias (= t*w1t + b1)
    w2_ref   : (Hp, Dp)  bf16 second-layer weight, resident
    b2_ref   : (1,  Dp)  f32  second-layer bias
    o_ref    : (TB, Dp)  f32  dxt/dt tile
    """
    # First matmul on the MXU in bf16, f32 accumulation.
    h = jnp.dot(x_ref[...], w1x_ref[...], preferred_element_type=jnp.float32)
    h = h + bias1_ref[...]                      # f32 bias (time already folded in)

    # SiLU in f32 (sigmoid's exp goes to the EUP slot).
    h = h * jax.nn.sigmoid(h)

    # Second matmul: cast activations to bf16 once, accumulate in f32.
    out = jnp.dot(h.astype(w2_ref.dtype), w2_ref[...],
                  preferred_element_type=jnp.float32)
    out = out + b2_ref[...]

    o_ref[...] = out.astype(o_ref.dtype)


def model_wrapper_no_context(t, x, params, *, tile_b=None):
    """Forward pass of ModelWrapperNoContext.

    Args:
      t: scalar flow time (shape (), (1,) or (1,1)).
      x: (B, D) input (concatenation of [actual input, context]).
      params: dict with 'w1x' (D,H), 'w1t' (1,H), 'b1' (1,H),
              'w2' (H,D), 'b2' (1,D) in float32.

    Returns:
      dxt_dt of shape (B, D), float32.
    """
    B, D = x.shape
    w1x, w1t, b1 = params["w1x"], params["w1t"], params["b1"]
    w2, b2 = params["w2"], params["b2"]
    H = w1x.shape[1]

    # t_broadcasted = t.expand(x.shape[0], 1): a single scalar flow time shared
    # by every row.  Guard against per-sample t being silently truncated.
    t_flat = jnp.asarray(t, jnp.float32).reshape(-1)
    assert t_flat.shape[0] == 1, "ModelWrapperNoContext expects a scalar flow time"
    t_scalar = t_flat[0]

    # Fold t into the first-layer bias: bias_eff = t * w1t + b1  (one (1,H) row,
    # trivial XLA op) -> the kernel never sees t.
    bias1 = t_scalar * w1t.astype(jnp.float32) + b1.astype(jnp.float32)

    # Lane-dense padding for both matmuls and the output store.
    Dp = _round_up(D, 128)
    Hp = _round_up(H, 128)
    if tile_b is None:
        tile_b = _choose_tile_b(B)
    tile_b = _round_up(tile_b, 16)            # bf16 sublane alignment
    Bp = _round_up(B, tile_b)

    x_p = jnp.zeros((Bp, Dp), jnp.bfloat16).at[:B, :D].set(x.astype(jnp.bfloat16))
    w1x_p = jnp.zeros((Dp, Hp), jnp.bfloat16).at[:D, :H].set(w1x.astype(jnp.bfloat16))
    bias1_p = jnp.zeros((1, Hp), jnp.float32).at[:, :H].set(bias1)
    w2_p = jnp.zeros((Hp, Dp), jnp.bfloat16).at[:H, :D].set(w2.astype(jnp.bfloat16))
    b2_p = jnp.zeros((1, Dp), jnp.float32).at[:, :D].set(b2.astype(jnp.float32))

    grid = (Bp // tile_b,)

    # Advisory cost estimate for XLA scheduling around the call.
    flops = 2 * Bp * Dp * Hp + 2 * Bp * Hp * Dp
    transcendentals = Bp * Hp
    bytes_accessed = (Bp * Dp * 2                     # x (bf16 in)
                      + Dp * Hp * 2 + Hp * Dp * 2     # weights (bf16)
                      + Hp * 4 + Dp * 4               # biases (f32)
                      + Bp * Dp * 4)                  # out (f32)

    # VMEM budget: double-buffered x/out tiles + (implicitly double-buffered)
    # resident bf16 weights + biases, with headroom.  Clamped so it never drops
    # below the default scoped limit and never asks beyond v7x physical VMEM.
    vmem_bytes = (2 * tile_b * Dp * 2        # x tiles (bf16)
                  + 2 * tile_b * Dp * 4      # out tiles (f32)
                  + 2 * Dp * Hp * 2          # w1x
                  + 2 * Hp * Dp * 2          # w2
                  + 2 * (Hp + Dp) * 4)       # biases
    vmem_limit = int(min(max(2 * vmem_bytes, 32 * 1024 * 1024), 96 * 1024 * 1024))

    out_p = pl.pallas_call(
        _vf_kernel,
        out_shape=jax.ShapeDtypeStruct((Bp, Dp), jnp.float32),
        grid_spec=pltpu.PrefetchScalarGridSpec(
            num_scalar_prefetch=0,
            grid=grid,
            in_specs=[
                pl.BlockSpec((tile_b, Dp), lambda i: (i, 0)),   # x tile
                pl.BlockSpec((Dp, Hp), lambda i: (0, 0)),       # w1x (resident)
                pl.BlockSpec((1, Hp), lambda i: (0, 0)),        # bias1 = t*w1t + b1
                pl.BlockSpec((Hp, Dp), lambda i: (0, 0)),       # w2 (resident)
                pl.BlockSpec((1, Dp), lambda i: (0, 0)),        # b2
            ],
            out_specs=pl.BlockSpec((tile_b, Dp), lambda i: (i, 0)),
        ),
        compiler_params=pltpu.CompilerParams(
            dimension_semantics=("parallel",),
            vmem_limit_bytes=vmem_limit,
        ),
        cost_estimate=pl.CostEstimate(
            flops=flops,
            transcendentals=transcendentals,
            bytes_accessed=bytes_accessed,
        ),
    )(x_p, w1x_p, bias1_p, w2_p, b2_p)

    # TODO(synk): if D*H ever outgrows v7x's 64 MiB VMEM alongside the batch
    # tile, add a reduction grid axis over H with a P3 accumulator instead of
    # keeping both full weight matrices resident.
    return out_p[:B, :D]


def init_params(key, D, H):
    """Deterministic synthetic base-model parameters (not a checkpoint load)."""
    k1, k2, k3 = jax.random.split(key, 3)
    scale1 = 1.0 / jnp.sqrt(jnp.float32(D + 1))
    scale2 = 1.0 / jnp.sqrt(jnp.float32(H))
    return {
        "w1x": jax.random.normal(k1, (D, H), jnp.float32) * scale1,
        "w1t": jax.random.normal(k2, (1, H), jnp.float32) * scale1,
        "b1": jnp.zeros((1, H), jnp.float32),
        "w2": jax.random.normal(k3, (H, D), jnp.float32) * scale2,
        "b2": jnp.zeros((1, D), jnp.float32),
    }


def _reference(t, x, params):
    """Pure-JAX f32 reference (mirrors the PyTorch wrapper + CFM MLP)."""
    B = x.shape[0]
    t_b = jnp.broadcast_to(jnp.asarray(t, jnp.float32).reshape(1, 1), (B, 1))
    h = x @ params["w1x"] + t_b * params["w1t"] + params["b1"]
    h = h * jax.nn.sigmoid(h)
    return h @ params["w2"] + params["b2"]


if __name__ == "__main__":
    key = jax.random.PRNGKey(0)
    kx, kt, kp = jax.random.split(key, 3)

    B, D, H = 8, 32, 64   # batch, feature dim (input+context), hidden dim
    x = jax.random.normal(kx, (B, D), jnp.float32)
    t = jax.random.uniform(kt, (1,), jnp.float32)   # scalar flow time

    params = init_params(kp, D, H)

    dxt_dt = model_wrapper_no_context(t, x, params)
    dxt_dt = jax.block_until_ready(dxt_dt)

    ref = _reference(t, x, params)
    assert dxt_dt.shape == (B, D)
    max_err = float(jnp.max(jnp.abs(dxt_dt - ref)))
    # bf16 MXU inputs with f32 accumulation -> loose-but-safe tolerance.
    assert jnp.allclose(dxt_dt, ref, atol=3e-2, rtol=3e-2), (
        f"mismatch vs reference, max abs err = {max_err}")

    print("KERNEL_OK")
</pallas_src>

<mosaic_0001>
module attributes {stable_mosaic.version = 11 : i64} {
  func.func @_vf_kernel(%arg0: i32, %arg1: memref<16x128xbf16, #tpu.memory_space<vmem>>, %arg2: memref<128x128xbf16, #tpu.memory_space<vmem>>, %arg3: memref<1x128xf32, #tpu.memory_space<vmem>>, %arg4: memref<128x128xbf16, #tpu.memory_space<vmem>>, %arg5: memref<1x128xf32, #tpu.memory_space<vmem>>, %arg6: memref<16x128xf32, #tpu.memory_space<vmem>>) attributes {dimension_semantics = [#tpu.dimension_semantics<parallel>], iteration_bounds = array<i64: 1>, scalar_prefetch = 0 : i64, scratch_operands = 0 : i64, tpu.core_type = #tpu.core_type<tc>, window_params = [{transform_indices = @transform_0, window_bounds = array<i64: 16, 128>}, {pipeline_mode = #tpu.pipeline_mode<synchronous>, transform_indices = @transform_1, window_bounds = array<i64: 128, 128>}, {pipeline_mode = #tpu.pipeline_mode<synchronous>, transform_indices = @transform_2, window_bounds = array<i64: 1, 128>}, {pipeline_mode = #tpu.pipeline_mode<synchronous>, transform_indices = @transform_3, window_bounds = array<i64: 128, 128>}, {pipeline_mode = #tpu.pipeline_mode<synchronous>, transform_indices = @transform_4, window_bounds = array<i64: 1, 128>}, {transform_indices = @transform_5, window_bounds = array<i64: 16, 128>}]} {
    %c0 = arith.constant 0 : index
    %c0_0 = arith.constant 0 : index
    %0 = vector.load %arg1[%c0, %c0_0] : memref<16x128xbf16, #tpu.memory_space<vmem>>, vector<16x128xbf16>
    %c0_1 = arith.constant 0 : index
    %c0_2 = arith.constant 0 : index
    %1 = vector.load %arg2[%c0_1, %c0_2] : memref<128x128xbf16, #tpu.memory_space<vmem>>, vector<128x128xbf16>
    %cst = arith.constant dense<0.000000e+00> : vector<16x128xf32>
    %2 = tpu.matmul %0, %1, %cst {dimension_numbers = #tpu.dot_dimension_numbers<[1], [0], [0], [1], [0, 0, 1, 1], [], []>} : vector<16x128xbf16>, vector<128x128xbf16>, vector<16x128xf32> -> vector<16x128xf32>
    %c0_3 = arith.constant 0 : index
    %c0_4 = arith.constant 0 : index
    %3 = vector.load %arg3[%c0_3, %c0_4] : memref<1x128xf32, #tpu.memory_space<vmem>>, vector<1x128xf32>
    %4 = vector.broadcast %3 : vector<1x128xf32> to vector<16x128xf32>
    %5 = arith.addf %2, %4 : vector<16x128xf32>
    %6 = arith.negf %5 : vector<16x128xf32>
    %7 = math.exp %6 : vector<16x128xf32>
    %cst_5 = arith.constant 1.000000e+00 : f32
    %8 = vector.broadcast %cst_5 : f32 to vector<16x128xf32>
    %9 = arith.addf %8, %7 : vector<16x128xf32>
    %10 = arith.divf %8, %9 : vector<16x128xf32>
    %11 = arith.mulf %5, %10 : vector<16x128xf32>
    %12 = arith.truncf %11 : vector<16x128xf32> to vector<16x128xbf16>
    %c0_6 = arith.constant 0 : index
    %c0_7 = arith.constant 0 : index
    %13 = vector.load %arg4[%c0_6, %c0_7] : memref<128x128xbf16, #tpu.memory_space<vmem>>, vector<128x128xbf16>
    %cst_8 = arith.constant dense<0.000000e+00> : vector<16x128xf32>
    %14 = tpu.matmul %12, %13, %cst_8 {dimension_numbers = #tpu.dot_dimension_numbers<[1], [0], [0], [1], [0, 0, 1, 1], [], []>} : vector<16x128xbf16>, vector<128x128xbf16>, vector<16x128xf32> -> vector<16x128xf32>
    %c0_9 = arith.constant 0 : index
    %c0_10 = arith.constant 0 : index
    %15 = vector.load %arg5[%c0_9, %c0_10] : memref<1x128xf32, #tpu.memory_space<vmem>>, vector<1x128xf32>
    %16 = vector.broadcast %15 : vector<1x128xf32> to vector<16x128xf32>
    %17 = arith.addf %14, %16 : vector<16x128xf32>
    %c0_11 = arith.constant 0 : index
    %c0_12 = arith.constant 0 : index
    %18 = vector.load %arg6[%c0_11, %c0_12] : memref<16x128xf32, #tpu.memory_space<vmem>>, vector<16x128xf32>
    tpu.vector_store %arg6[%c0_11, %c0_12], %17 {strides = array<i32>} : memref<16x128xf32, #tpu.memory_space<vmem>>, vector<16x128xf32>,
    return
  }
  func.func @transform_0(%arg0: i32) -> (i32, i32) {
    %c0_i32 = arith.constant 0 : i32
    %c0_i32_0 = arith.constant 0 : i32
    return %arg0, %c0_i32 : i32, i32
  }
  func.func @transform_1(%arg0: i32) -> (i32, i32) {
    %c0_i32 = arith.constant 0 : i32
    %c0_i32_0 = arith.constant 0 : i32
    %c0_i32_1 = arith.constant 0 : i32
    return %c0_i32, %c0_i32_0 : i32, i32
  }
  func.func @transform_2(%arg0: i32) -> (i32, i32) {
    %c0_i32 = arith.constant 0 : i32
    %c0_i32_0 = arith.constant 0 : i32
    %c0_i32_1 = arith.constant 0 : i32
    return %c0_i32, %c0_i32_0 : i32, i32
  }
  func.func @transform_3(%arg0: i32) -> (i32, i32) {
    %c0_i32 = arith.constant 0 : i32
    %c0_i32_0 = arith.constant 0 : i32
    %c0_i32_1 = arith.constant 0 : i32
    return %c0_i32, %c0_i32_0 : i32, i32
  }
  func.func @transform_4(%arg0: i32) -> (i32, i32) {
    %c0_i32 = arith.constant 0 : i32
    %c0_i32_0 = arith.constant 0 : i32
    %c0_i32_1 = arith.constant 0 : i32
    return %c0_i32, %c0_i32_0 : i32, i32
  }
  func.func @transform_5(%arg0: i32) -> (i32, i32) {
    %c0_i32 = arith.constant 0 : i32
    %c0_i32_0 = arith.constant 0 : i32
    return %arg0, %c0_i32 : i32, i32
  }
}

</mosaic_0001>

<bundles_post_ra>
// kernel: tpu_custom_call.1
= control target key start
LH: loop header
LB: loop body
LE: loop exit
PB: predicated region body
PF: predicated region fallthrough
CT: control target
= control target key end

     0   :  { %10 = vsyncpa [#allocation3], 0  ;;  %s648_s0 = inlined_call_operand.hbm [shape: bf16[16,128], index: 0, kind: input, shape index: {}]   ;;  %s649_s1 = inlined_call_operand.hbm [shape: bf16[128,128], index: 1, kind: input, shape index: {}]   ;;  %s650_s2 = inlined_call_operand.vmem [shape: f32[1,128], index: 2, kind: input, shape index: {}]   ;;  %s651_s3 = inlined_call_operand.hbm [shape: bf16[128,128], index: 3, kind: input, shape index: {}]   ;;  %s652_s4 = inlined_call_operand.vmem [shape: f32[1,128], index: 4, kind: input, shape index: {}]   ;;  %s653_s5 = inlined_call_operand.hbm [shape: f32[16,128], index: 5, kind: output, shape index: {}]  }
   0x1   :  { %11 = vsyncpa [#allocation6], 0 }
   0x2   :  { %12 = vsyncpa [#allocation4], 0  ;;  %s538_s18 = smov [#allocation5]   ;;  %s539_s20 = smov [#allocation2]  }
   0x3   :  { %s30_s19 = sshll.u32 %s538_s18, 4  ;;  %s18_s21 = sshll.u32 %s539_s20, 4  ;;  %s31_s19 = int_to_ptr.vmem [resolvable:$true] %s30_s19  ;;  %s578_s21 = int_to_ptr.vmem [resolvable:$true] %s18_s21 }
   0x4   :  { %s444_s24 = scalar_lea.hbm %s649_s1, 1024 }
   0x5   :  { %p445_p0 = scmp.ne.s32.totalorder %s649_s1, %s444_s24  ;;  %p448_p1 = scmp.lt.u32.totalorder %s444_s24, %s649_s1 }
   0x7   :  { %p450_p2 = pnand %p448_p1, %p445_p0 }
   0x9   :  { %453 = shalt.err (!%p450_p2)
}
   0xa   :  { %s454_s29 = scalar_lea.vmem %s31_s19, 1024  ;;  %p459_p4 = scmp.lt.s32.totalorder %s31_s19, %s31_s19 }
   0xb   :  { %p455_p3 = scmp.ne.s32.totalorder %s31_s19, %s454_s29  ;;  %p460_p5 = scmp.lt.s32.totalorder %s454_s29, %s454_s29 }
   0xd   :  { %p461_p6 = por %p460_p5, %p459_p4 }
   0xf   :  { %p462_p7 = pnand %p461_p6, %p455_p3 }
  0x11   :  { %465 = shalt.err (!%p462_p7)
}
  0x12   :  { %s540_s30 = smov 64   ;;  %s541_s6 = smov 4  }
  0x13   :  { %36 = dma.hbm_to_vmem [thread:$0]  %s649_s1, 1024, %s31_s19, [#allocation6], %s540_s30, %s540_s30, %s541_s6  }
  0x14   :  { %s466_s11 = scalar_lea.hbm %s648_s0, 128 }
  0x15   :  { %p467_p8 = scmp.ne.s32.totalorder %s648_s0, %s466_s11  ;;  %p470_p9 = scmp.lt.u32.totalorder %s466_s11, %s648_s0 }
  0x17   :  { %p472_p10 = pnand %p470_p9, %p467_p8 }
  0x19   :  { %475 = shalt.err (!%p472_p10)
}
  0x1a   :  { %s476_s16 = scalar_lea.vmem %s578_s21, 128  ;;  %p481_p12 = scmp.lt.s32.totalorder %s578_s21, %s578_s21 }
  0x1b   :  { %p477_p11 = scmp.ne.s32.totalorder %s578_s21, %s476_s16  ;;  %p482_p13 = scmp.lt.s32.totalorder %s476_s16, %s476_s16 }
  0x1d   :  { %p483_p0 = por %p482_p13, %p481_p12 }
  0x1f   :  { %p484_p1 = pnand %p483_p0, %p477_p11 }
  0x21   :  { %487 = shalt.err (!%p484_p1)
}
  0x22   :  { %24 = dma.hbm_to_vmem [thread:$0]  %s648_s0, 128, %s578_s21, [#allocation3], %s540_s30, %s540_s30, %s541_s6  }
  0x23   :  { %s542_s18 = smov [#allocation7]   ;;  %s488_s23 = scalar_lea.hbm %s651_s3, 1024 }
  0x24   :  { %s44_s19 = sshll.u32 %s542_s18, 4  ;;  %p489_p2 = scmp.ne.s32.totalorder %s651_s3, %s488_s23  ;;  %s45_s19 = int_to_ptr.vmem [resolvable:$true] %s44_s19 }
  0x25   :  { %p492_p3 = scmp.lt.u32.totalorder %s488_s23, %s651_s3 }
  0x27   :  { %p494_p4 = pnand %p492_p3, %p489_p2 }
  0x29   :  { %497 = shalt.err (!%p494_p4)
}
  0x2a   :  { %s498_s28 = scalar_lea.vmem %s45_s19, 1024  ;;  %p503_p6 = scmp.lt.s32.totalorder %s45_s19, %s45_s19 }
  0x2b   :  { %p499_p5 = scmp.ne.s32.totalorder %s45_s19, %s498_s28  ;;  %p504_p7 = scmp.lt.s32.totalorder %s498_s28, %s498_s28 }
  0x2d   :  { %p505_p8 = por %p504_p7, %p503_p6 }
  0x2f   :  { %p506_p9 = pnand %p505_p8, %p499_p5 }
  0x31   :  { %509 = shalt.err (!%p506_p9)
}
  0x32   :  { %50 = dma.hbm_to_vmem [thread:$0]  %s651_s3, 1024, %s45_s19, [#allocation6], %s540_s30, %s540_s30, %s541_s6  }
  0x33   :  { %532 = dma.done.wait [#allocation3], 128  }
  0x34   :  { %533 = vsyncadd [#allocation3], 4294967168 }
  0x35   :  { %534 = dma.done.wait [#allocation6], 2048  }
  0x36   :  { %535 = vsyncadd [#allocation6], 4294965248  ;;  %v543_v0 = vmov 0.0   ;;  %vm544_vm0 = vmmov 0   ;;  %v419_v1 = vld [vmem:[#allocation5] sm:$0xff]   ;;  %v420_v2 = vld [vmem:[#allocation5 + $0x8] sm:$0xff]  }
  0x37   :  { %369 = vmatprep.subr.bf16.mxu0 %v543_v0  ;;  %385 = vmatprep.mubr.msk.bf16.mxu0 %vm544_vm0, %v543_v0  ;;  %v421_v3 = vld [vmem:[#allocation5 + $0x10] sm:$0xff]   ;;  %v422_v4 = vld [vmem:[#allocation5 + $0x18] sm:$0xff]   ;;  %v423_v5 = vld [vmem:[#allocation5 + $0x20] sm:$0xff]   ;;  %s545_s6 = smov [#allocation8]  }
  0x38   :  { %389 = vmatprep.subr.bf16.mxu1 %v543_v0  ;;  %405 = vmatprep.mubr.msk.bf16.mxu1 %vm544_vm0, %v543_v0  ;;  %v424_v6 = vld [vmem:[#allocation5 + $0x28] sm:$0xff]   ;;  %v425_v7 = vld [vmem:[#allocation5 + $0x30] sm:$0xff]   ;;  %v426_v8 = vld [vmem:[#allocation5 + $0x38] sm:$0xff]   ;;  %s317_s7 = sshll.u32 %s545_s6, 4  ;;  %s318_s7 = int_to_ptr.vmem [resolvable:$true] %s317_s7 }
  0x39   :  { %370 = vmatpush3.bf16.msra.mxu0 %v419_v1  ;;  %v427_v9 = vld [vmem:[#allocation2] sm:$0xff]   ;;  %v428_v10 = vld [vmem:[#allocation7] sm:$0xff]   ;;  %v429_v11 = vld [vmem:[#allocation7 + $0x8] sm:$0xff]   ;;  %s510_s8 = scalar_lea.vmem %s318_s7, 256  ;;  %p515_p11 = scmp.lt.s32.totalorder %s318_s7, %s318_s7 }
  0x3a   :  { %371 = vmatprep.subr.bf16.mxu0 %v543_v0  ;;  %390 = vmatpush3.bf16.msra.mxu1 %v428_v10  ;;  %v430_v12 = vld [vmem:[#allocation7 + $0x10] sm:$0xff]   ;;  %v431_v13 = vld [vmem:[#allocation7 + $0x18] sm:$0xff]   ;;  %v432_v14 = vld [vmem:[#allocation7 + $0x20] sm:$0xff]   ;;  %p511_p10 = scmp.ne.s32.totalorder %s318_s7, %s510_s8  ;;  %p516_p12 = scmp.lt.s32.totalorder %s510_s8, %s510_s8 }
  0x3b   :  { %391 = vmatprep.subr.bf16.mxu1 %v543_v0  ;;  %v433_v15 = vld [vmem:[#allocation7 + $0x28] sm:$0xff]   ;;  %v434_v16 = vld [vmem:[#allocation7 + $0x30] sm:$0xff]   ;;  %v435_v17 = vld [vmem:[#allocation7 + $0x38] sm:$0xff]  }
  0x3c   :  { %v330_v18 = vld [vmem:[%s650_s2] ss:$0 sm:$0xff]  ;;  %p517_p13 = por %p516_p12, %p515_p11 }
  0x3d   :  { %372 = vmatpush3.bf16.msra.mxu0 %v420_v2  ;;  %v342_v36 = vld [vmem:[%s652_s4] ss:$0 sm:$0xff] }
  0x3e   :  { %373 = vmatprep.subr.bf16.mxu0 %v543_v0  ;;  %392 = vmatpush3.bf16.msra.mxu1 %v429_v11  ;;  %p518_p0 = pnand %p517_p13, %p511_p10 }
  0x3f   :  { %393 = vmatprep.subr.bf16.mxu1 %v543_v0 }
  0x41   :  { %374 = vmatpush3.bf16.msra.mxu0 %v421_v3 }
  0x42   :  { %375 = vmatprep.subr.bf16.mxu0 %v543_v0  ;;  %394 = vmatpush3.bf16.msra.mxu1 %v430_v12 }
  0x43   :  { %395 = vmatprep.subr.bf16.mxu1 %v543_v0 }
  0x45   :  { %376 = vmatpush3.bf16.msra.mxu0 %v422_v4 }
  0x46   :  { %377 = vmatprep.subr.bf16.mxu0 %v543_v0  ;;  %396 = vmatpush3.bf16.msra.mxu1 %v431_v13 }
  0x47   :  { %397 = vmatprep.subr.bf16.mxu1 %v543_v0 }
  0x49   :  { %378 = vmatpush3.bf16.msra.mxu0 %v423_v5 }
  0x4a   :  { %379 = vmatprep.subr.bf16.mxu0 %v543_v0  ;;  %398 = vmatpush3.bf16.msra.mxu1 %v432_v14 }
  0x4b   :  { %399 = vmatprep.subr.bf16.mxu1 %v543_v0 }
  0x4d   :  { %380 = vmatpush3.bf16.msra.mxu0 %v424_v6 }
  0x4e   :  { %381 = vmatprep.subr.bf16.mxu0 %v543_v0  ;;  %400 = vmatpush3.bf16.msra.mxu1 %v433_v15 }
  0x4f   :  { %401 = vmatprep.subr.bf16.mxu1 %v543_v0 }
  0x51   :  { %382 = vmatpush3.bf16.msra.mxu0 %v425_v7 }
  0x52   :  { %383 = vmatprep.subr.bf16.mxu0 %v543_v0  ;;  %402 = vmatpush3.bf16.msra.mxu1 %v434_v16 }
  0x53   :  { %403 = vmatprep.subr.bf16.mxu1 %v543_v0 }
  0x55   :  { %384 = vmatpush3.bf16.msra.mxu0 %v426_v8 }
  0x56   :  { %404 = vmatpush3.bf16.msra.mxu1 %v435_v17 }
  0x58   :  { %386 = vmatmul.mubr.bf16.vlgmr.msra.gmra.mrb[0].mxu0 %v427_v9 }
 0x12b   :  { %v176_v19 = vpop.f32.mrb[0].mxu0 }
 0x12c   :  { %v177_v20 = vadd.f32 %v330_v18, %v176_v19  ;;  %v387_v21 = vpop.f32.mrb[1].mxu0 }
 0x12d   :  { %v179_v22 = vpop.f32.mrb[2].mxu0 }
 0x12e   :  { %v340_v23 = vmul.f32 -1.442695, %v177_v20  ;;  %v180_v24 = vadd.f32 %v330_v18, %v179_v22  ;;  %v388_v25 = vpop.f32.mrb[3].mxu0 }
 0x130   :  { %436 = vpow2.f32 %v340_v23  ;;  %v341_v26 = vmul.f32 -1.442695, %v180_v24 }
 0x132   :  { %438 = vpow2.f32 %v341_v26 }
 0x13a   :  { %v437_v27 = vpop.eup %436 }
 0x13b   :  { %v189_v28 = vadd.f32 1.0, %v437_v27 }
 0x13c   :  { %v439_v29 = vpop.eup %438 }
 0x13d   :  { %440 = vrcp.f32 %v189_v28  ;;  %v190_v30 = vadd.f32 1.0, %v439_v29 }
 0x13f   :  { %442 = vrcp.f32 %v190_v30 }
 0x147   :  { %v441_v31 = vpop.eup %440 }
 0x148   :  { %v195_v33 = vmul.f32 %v441_v31, %v177_v20 }
 0x149   :  { %v443_v32 = vpop.eup %442 }
 0x14a   :  { %v196_v34 = vmul.f32 %v443_v32, %v180_v24 }
 0x14c   :  { %v197_v35 = vpack.c.bf16 %v196_v34, %v195_v33 }
 0x14e   :  { %406 = vmatmul.mubr.bf16.vlgmr.msra.gmra.mrb[0].mxu1 %v197_v35 }
 0x221   :  { %v303_v37 = vpop.f32.mrb[0].mxu1 }
 0x222   :  { %v304_v38 = vadd.f32 %v342_v36, %v303_v37  ;;  %v407_v39 = vpop.f32.mrb[1].mxu1 }
 0x223   :  { %v306_v40 = vpop.f32.mrb[2].mxu1 }
 0x224   :  { %310 = vst [vmem:[#allocation8] sm:$0xff] %v304_v38  ;;  %v307_v41 = vadd.f32 %v342_v36, %v306_v40  ;;  %v408_v42 = vpop.f32.mrb[3].mxu1 }
 0x226   :  { %311 = vst [vmem:[#allocation8 + $0x8] sm:$0xff] %v307_v41 }
 0x227   :  { %521 = shalt.err (!%p518_p0)
}
 0x228   :  { %s522_s10 = scalar_lea.hbm %s653_s5, 256 }
 0x229   :  { %p523_p1 = scmp.ne.s32.totalorder %s653_s5, %s522_s10  ;;  %p526_p2 = scmp.lt.u32.totalorder %s522_s10, %s653_s5 }
 0x22b   :  { %p528_p3 = pnand %p526_p2, %p523_p1 }
 0x22d   :  { %531 = shalt.err (!%p528_p3)
}
 0x22e   :  { %s546_s15 = smov 128   ;;  %s547_s16 = smov 8  }
 0x22f   :  { %323 = dma.vmem_to_hbm [thread:$0]  %s318_s7, 256, %s653_s5, [#allocation4], %s546_s15, %s546_s15, %s547_s16  }
 0x230   :  { %536 = dma.done.wait [#allocation4], 256  }
 0x231   :  { %537 = vsyncadd [#allocation4], 4294967040 }
 0x232   :  { %327 = vsyncpa [#allocation3], 1 }
 0x233   :  { %328 = vsyncpa [#allocation6], 1 }
 0x234   :  { %329 = vsyncpa [#allocation4], 1 }

</bundles_post_ra>
